<compile_context>
chip_gen: v6e
topology: v6e:2x2x1
jax: 0.10.0
libtpu: 0.0.40
codegen_flags: <defaults>
</compile_context>

<pallas_src>
import math

import jax
import jax.numpy as jnp
import numpy as np
from jax.experimental import pallas as pl
from jax.experimental.pallas import tpu as pltpu


# ----------------------------------------------------------------------------
# batch_to_device — `.to(device)` semantics.  No Pallas kernel: arrays handed
# to the component are already on device; jax.device_put is a no-op/cheap move.
# ----------------------------------------------------------------------------
def batch_to_device(batch, device=None):
    """Recursive traversal identical to TorchComponent.batch_to_device."""
    if device is None:
        device = jax.devices()[0]
    if isinstance(batch, jax.Array):
        return jax.device_put(batch, device)
    if isinstance(batch, dict):
        return {k: batch_to_device(v, device) for k, v in batch.items()}
    if isinstance(batch, (list, tuple, set)):
        return type(batch)(batch_to_device(v, device) for v in batch)
    return batch


# ----------------------------------------------------------------------------
# Helpers
# ----------------------------------------------------------------------------
def _cdiv(a: int, b: int) -> int:
    return -(-a // b)


def _round_up(x: int, m: int) -> int:
    return _cdiv(x, m) * m


def _tpu_generation() -> str:
    """Detect TPU generation from the device kind string."""
    try:
        kind = jax.devices()[0].device_kind.lower()
    except Exception:
        return "unknown"
    if "v7" in kind or "7x" in kind:
        return "v7"
    if "v6" in kind:
        return "v6"
    if "v5" in kind:
        return "v5"
    return "unknown"


def _default_tiles(gen: str):
    """Roofline-driven tile sizes per generation (bf16 operands, f32 acc).

    Arithmetic intensity of this streaming matmul ~ tm*tn/(tm+tn) FLOP/byte:
      v7x crossover ~310 FLOP/byte  -> need >=1024x1024 output tiles,
      v6e crossover ~650 FLOP/byte  -> 1024x2048,
      v5e crossover ~240 FLOP/byte  -> 512x512 is already compute-bound.
    """
    if gen == "v7":
        return 1024, 1024, 512
    if gen == "v6":
        return 1024, 2048, 512
    # v5e and unknown: compute-bound at 512x512, small VMEM footprint.
    return 512, 512, 512


def _choose_tiles(M: int, N: int, K: int, gen: str, tiles):
    if tiles is not None:
        tm, tn, tk = tiles
    else:
        tm, tn, tk = _default_tiles(gen)
        # MXU on v6e/v7x is 2x256x256 -> keep tiles multiples of 256 where the
        # problem allows; v5e's 128x128 MXU is fine with 128-multiples.
        align = 256 if gen in ("v6", "v7") else 128
        tm = min(tm, _round_up(M, align))
        tn = min(tn, _round_up(N, align))
        # Keep both v7x TensorCores busy: if both parallel axes collapse to a
        # single block, split N into (at least) two blocks.
        if _cdiv(M, tm) == 1 and _cdiv(N, tn) == 1:
            half = _round_up(_cdiv(N, 2), 128)
            if half >= 256:
                tn = min(tn, half)
    tk = min(tk, _round_up(K, 128))
    # Hardware layout requirements: sublane multiple of 8, lane multiple of 128.
    assert tm % 8 == 0 and tn % 128 == 0 and tk % 128 == 0, (tm, tn, tk)
    return tm, tn, tk


def _vmem_limit_bytes(tm: int, tn: int, tk: int, out_itemsize: int, gen: str) -> int:
    """Scoped-VMEM budget from the real tile footprint (+ headroom)."""
    footprint = (
        2 * (tm * tk + tk * tn) * 2      # double-buffered bf16 input tiles
        + 2 * tn * 4                     # double-buffered f32 bias tile
        + 2 * tm * tn * out_itemsize     # double-buffered output tile
        + tm * tn * 4                    # f32 accumulator scratch
    )
    limit = int(footprint * 1.3) + (2 << 20)     # headroom for Mosaic internals
    phys = (64 << 20) if gen == "v7" else (128 << 20)
    return max(32 << 20, min(limit, phys - (4 << 20)))


# ----------------------------------------------------------------------------
# Tiled dense projection:  out = x @ W + b
#   grid = (M/tm, N/tn, K/tk); f32 accumulator in VMEM scratch across K;
#   bias folded into the k==0 init; finalize is a pure cast + store.
# ----------------------------------------------------------------------------
def _linear_kernel(x_ref, w_ref, b_ref, o_ref, acc_ref):
    @pl.when(pl.program_id(2) == 0)
    def _init():
        # Bias (1, tn) f32 broadcast into the accumulator -> added exactly once
        # and removes an extra read-modify-write from the last K step.
        acc_ref[...] = jnp.broadcast_to(b_ref[...], acc_ref.shape)

    acc_ref[...] += jnp.dot(
        x_ref[...], w_ref[...], preferred_element_type=jnp.float32
    )

    @pl.when(pl.program_id(2) == pl.num_programs(2) - 1)
    def _finalize():
        o_ref[...] = acc_ref[...].astype(o_ref.dtype)


def pallas_linear(x: jax.Array, w: jax.Array, b: jax.Array,
                  *, tiles=None, out_dtype=jnp.bfloat16,
                  min_pallas_flops=32 * 1024 * 1024) -> jax.Array:
    """out[..., :] = x[..., :] @ w + b   (bf16 MXU inputs, f32 accumulation).

    Passing explicit `tiles` forces the Pallas path; otherwise tiny problems
    fall back to plain XLA dot (the 3-axis grid pays ~0.35us/step).
    """
    *lead, K = x.shape
    Kw, N = w.shape
    assert K == Kw and b.shape == (N,)
    M = math.prod(lead) if lead else 1

    # Small-problem fallback: grid + pad overhead would dominate.
    if tiles is None and 2 * M * N * K < min_pallas_flops:
        y = jnp.dot(x.reshape(M, K).astype(jnp.bfloat16), w.astype(jnp.bfloat16),
                    preferred_element_type=jnp.float32) + b.astype(jnp.float32)
        return y.astype(out_dtype).reshape(*lead, N)

    gen = _tpu_generation()
    tm, tn, tk = _choose_tiles(M, N, K, gen, tiles)

    # bf16 operands on the MXU; keep weights bf16 end-to-end (no cast pass if
    # the caller already provides bf16).  Bias stays f32 for the exact init.
    x2 = x.reshape(M, K)
    if x2.dtype != jnp.bfloat16:
        x2 = x2.astype(jnp.bfloat16)
    w2 = w if w.dtype == jnp.bfloat16 else w.astype(jnp.bfloat16)
    b2 = b.reshape(1, N).astype(jnp.float32)

    # Only K padding is correctness-critical (zeros feed the accumulator);
    # partial M/N edge blocks are handled by Pallas' masked loads/stores.
    Kp = _round_up(K, tk)
    if Kp != K:
        x2 = jnp.pad(x2, ((0, 0), (0, Kp - K)))
        w2 = jnp.pad(w2, ((0, Kp - K), (0, 0)))

    grid = (_cdiv(M, tm), _cdiv(N, tn), Kp // tk)
    out_itemsize = np.dtype(out_dtype).itemsize

    # bytes_accessed reflects re-reads: x is streamed once per N block column,
    # w once per M block row.
    cost = pl.CostEstimate(
        flops=2 * M * N * Kp,
        transcendentals=0,
        bytes_accessed=(x2.size * 2 * grid[1]
                        + w2.size * 2 * grid[0]
                        + b2.size * 4 * grid[0]
                        + M * N * out_itemsize),
    )

    out = pl.pallas_call(
        _linear_kernel,
        out_shape=jax.ShapeDtypeStruct((M, N), out_dtype),
        grid_spec=pltpu.PrefetchScalarGridSpec(
            num_scalar_prefetch=0,
            grid=grid,
            in_specs=[
                pl.BlockSpec((tm, tk), lambda i, j, k: (i, k)),   # activations
                pl.BlockSpec((tk, tn), lambda i, j, k: (k, j)),   # weight
                pl.BlockSpec((1, tn), lambda i, j, k: (0, j)),    # bias
            ],
            out_specs=pl.BlockSpec((tm, tn), lambda i, j, k: (i, j)),
            scratch_shapes=[pltpu.VMEM((tm, tn), jnp.float32)],
        ),
        compiler_params=pltpu.CompilerParams(
            dimension_semantics=("parallel", "parallel", "arbitrary"),
            vmem_limit_bytes=_vmem_limit_bytes(tm, tn, tk, out_itemsize, gen),
        ),
        cost_estimate=cost,
    )(x2, w2, b2)

    return out.reshape(*lead, N)


# ----------------------------------------------------------------------------
# A minimal concrete "TorchComponent": dict-in / dict-out forward.
# ----------------------------------------------------------------------------
class JaxComponent:
    def __init__(self, hidden: int, out_dim: int):
        # Deterministic parameter init (synthetic; no checkpoint load).
        kw, kb = jax.random.split(jax.random.PRNGKey(42))
        # Weights kept bf16 end-to-end: no per-call cast/materialization pass.
        self.weight = (
            jax.random.normal(kw, (hidden, out_dim), jnp.float32)
            * (1.0 / jnp.sqrt(hidden))
        ).astype(jnp.bfloat16)
        self.bias = jax.random.normal(kb, (out_dim,), jnp.float32) * 0.01

    def forward(self, batch, *, tiles=None):
        x = batch["embeddings"]                    # [B, T, H]
        y = pallas_linear(x, self.weight, self.bias, tiles=tiles)
        return {"output": y}

    def __call__(self, batch, *, tiles=None):
        batch = batch_to_device(batch)             # .to(device) semantics
        return self.forward(batch, tiles=tiles)


if __name__ == "__main__":
    # Small but lane-dense shapes: M = B*T = 128, K = 256, N = 512.
    B, T, H, HO = 2, 64, 256, 512
    key = jax.random.PRNGKey(0)
    x = jax.random.normal(key, (B, T, H), jnp.float32)
    mask = jnp.ones((B, T), jnp.float32)

    component = JaxComponent(hidden=H, out_dim=HO)
    batch = {"embeddings": x, "mask": mask}

    # Explicit tiles force the Pallas path (bypassing the small-problem
    # fallback) and exercise the K-reduction accumulator, the bias-once init
    # and multiple N tiles: grid = (1, 2, 2).  Production calls leave
    # tiles=None and get the generation-aware roofline tiles.
    out = component(batch, tiles=(128, 256, 128))
    jax.block_until_ready(out["output"])

    # Sanity check against plain-JAX f32 reference (bf16 operand/output tol).
    w_f32 = component.weight.astype(jnp.float32)
    ref = x @ w_f32 + component.bias
    got = out["output"].astype(jnp.float32)
    assert out["output"].shape == (B, T, HO)
    assert out["output"].dtype == jnp.bfloat16
    err = float(jnp.max(jnp.abs(got - ref)))
    assert jnp.allclose(got, ref, atol=5e-2, rtol=5e-2), err
    print("KERNEL_OK")
</pallas_src>

<mosaic_0001>
module attributes {stable_mosaic.version = 11 : i64} {
  func.func @_linear_kernel(%arg0: i32, %arg1: i32, %arg2: i32, %arg3: memref<128x128xbf16, #tpu.memory_space<vmem>>, %arg4: memref<128x256xbf16, #tpu.memory_space<vmem>>, %arg5: memref<1x256xf32, #tpu.memory_space<vmem>>, %arg6: memref<128x256xbf16, #tpu.memory_space<vmem>>, %arg7: memref<128x256xf32, #tpu.memory_space<vmem>>) attributes {dimension_semantics = [#tpu.dimension_semantics<parallel>, #tpu.dimension_semantics<parallel>, #tpu.dimension_semantics<arbitrary>], iteration_bounds = array<i64: 1, 2, 2>, scalar_prefetch = 0 : i64, scratch_operands = 1 : i64, tpu.core_type = #tpu.core_type<tc>, window_params = [{transform_indices = @transform_0, window_bounds = array<i64: 128, 128>}, {transform_indices = @transform_1, window_bounds = array<i64: 128, 256>}, {transform_indices = @transform_2, window_bounds = array<i64: 1, 256>}, {transform_indices = @transform_3, window_bounds = array<i64: 128, 256>}]} {
    %c0_i32 = arith.constant 0 : i32
    %0 = arith.cmpi eq, %arg2, %c0_i32 : i32
    %1 = arith.extui %0 : i1 to i32
    %c0_i32_0 = arith.constant 0 : i32
    %2 = arith.cmpi ne, %1, %c0_i32_0 : i32
    scf.if %2 {
      %c0_9 = arith.constant 0 : index
      %c0_10 = arith.constant 0 : index
      %12 = vector.load %arg5[%c0_9, %c0_10] : memref<1x256xf32, #tpu.memory_space<vmem>>, vector<1x256xf32>
      %13 = vector.shape_cast %12 : vector<1x256xf32> to vector<1x256xf32>
      %14 = vector.broadcast %13 : vector<1x256xf32> to vector<128x256xf32>
      %c0_11 = arith.constant 0 : index
      %c0_12 = arith.constant 0 : index
      %15 = vector.load %arg7[%c0_11, %c0_12] : memref<128x256xf32, #tpu.memory_space<vmem>>, vector<128x256xf32>
      tpu.vector_store %arg7[%c0_11, %c0_12], %14 {strides = array<i32>} : memref<128x256xf32, #tpu.memory_space<vmem>>, vector<128x256xf32>,
    } else {
    }
    %c0 = arith.constant 0 : index
    %c0_1 = arith.constant 0 : index
    %3 = vector.load %arg7[%c0, %c0_1] : memref<128x256xf32, #tpu.memory_space<vmem>>, vector<128x256xf32>
    %c0_2 = arith.constant 0 : index
    %c0_3 = arith.constant 0 : index
    %4 = vector.load %arg3[%c0_2, %c0_3] : memref<128x128xbf16, #tpu.memory_space<vmem>>, vector<128x128xbf16>
    %c0_4 = arith.constant 0 : index
    %c0_5 = arith.constant 0 : index
    %5 = vector.load %arg4[%c0_4, %c0_5] : memref<128x256xbf16, #tpu.memory_space<vmem>>, vector<128x256xbf16>
    %cst = arith.constant dense<0.000000e+00> : vector<128x256xf32>
    %6 = tpu.matmul %4, %5, %cst {dimension_numbers = #tpu.dot_dimension_numbers<[1], [0], [0], [1], [0, 0, 1, 1], [], []>} : vector<128x128xbf16>, vector<128x256xbf16>, vector<128x256xf32> -> vector<128x256xf32>
    %7 = arith.addf %3, %6 : vector<128x256xf32>
    %c0_6 = arith.constant 0 : index
    %c0_7 = arith.constant 0 : index
    %8 = vector.load %arg7[%c0_6, %c0_7] : memref<128x256xf32, #tpu.memory_space<vmem>>, vector<128x256xf32>
    tpu.vector_store %arg7[%c0_6, %c0_7], %7 {strides = array<i32>} : memref<128x256xf32, #tpu.memory_space<vmem>>, vector<128x256xf32>,
    %c1_i32 = arith.constant 1 : i32
    %9 = arith.cmpi eq, %arg2, %c1_i32 : i32
    %10 = arith.extui %9 : i1 to i32
    %c0_i32_8 = arith.constant 0 : i32
    %11 = arith.cmpi ne, %10, %c0_i32_8 : i32
    scf.if %11 {
      %c0_9 = arith.constant 0 : index
      %c0_10 = arith.constant 0 : index
      %12 = vector.load %arg7[%c0_9, %c0_10] : memref<128x256xf32, #tpu.memory_space<vmem>>, vector<128x256xf32>
      %13 = arith.truncf %12 : vector<128x256xf32> to vector<128x256xbf16>
      %c0_11 = arith.constant 0 : index
      %c0_12 = arith.constant 0 : index
      %14 = vector.load %arg6[%c0_11, %c0_12] : memref<128x256xbf16, #tpu.memory_space<vmem>>, vector<128x256xbf16>
      tpu.vector_store %arg6[%c0_11, %c0_12], %13 {strides = array<i32>} : memref<128x256xbf16, #tpu.memory_space<vmem>>, vector<128x256xbf16>,
    } else {
    }
    return
  }
  func.func @transform_0(%arg0: i32, %arg1: i32, %arg2: i32) -> (i32, i32) {
    %c0_i32 = arith.constant 0 : i32
    return %arg0, %arg2 : i32, i32
  }
  func.func @transform_1(%arg0: i32, %arg1: i32, %arg2: i32) -> (i32, i32) {
    %c0_i32 = arith.constant 0 : i32
    return %arg2, %arg1 : i32, i32
  }
  func.func @transform_2(%arg0: i32, %arg1: i32, %arg2: i32) -> (i32, i32) {
    %c0_i32 = arith.constant 0 : i32
    %c0_i32_0 = arith.constant 0 : i32
    return %c0_i32, %arg1 : i32, i32
  }
  func.func @transform_3(%arg0: i32, %arg1: i32, %arg2: i32) -> (i32, i32) {
    %c0_i32 = arith.constant 0 : i32
    return %arg0, %arg1 : i32, i32
  }
}

</mosaic_0001>

<bundles_post_ra>
// kernel: tpu_custom_call.1
= control target key start
LH: loop header
LB: loop body
LE: loop exit
PB: predicated region body
PF: predicated region fallthrough
CT: control target
= control target key end

     0   :  { %s1957_s0 = inlined_call_operand.hbm [shape: bf16[128,256], index: 0, kind: input, shape index: {}]   ;;  %s1958_s1 = inlined_call_operand.hbm [shape: bf16[256,512], index: 1, kind: input, shape index: {}]   ;;  %s1959_s2 = inlined_call_operand.hbm [shape: f32[1,512], index: 2, kind: input, shape index: {}]   ;;  %s1960_s3 = inlined_call_operand.hbm [shape: bf16[128,512], index: 3, kind: output, shape index: {}]  }
   0x1   :  { %1966 = sst [smem:[#allocation20_spill]] %s1957_s0 }
   0x2   :  { %1967 = sst [smem:[#allocation21_spill]] %s1958_s1 }
   0x3   :  { %1968 = sst [smem:[#allocation22_spill]] %s1959_s2 }
   0x4   :  { %1969 = sst [smem:[#allocation23_spill]] %s1960_s3 }
   0x5   :  { %8 = vsyncpa [#allocation4], 0 }
   0x6   :  { %10 = vsyncpa [#allocation4 + $0x1], 0 }
   0x7   :  { %11 = vsyncpa [#allocation7], 0 }
   0x8   :  { %13 = vsyncpa [#allocation7 + $0x1], 0 }
   0x9   :  { %14 = vsyncpa [#allocation5], 0 }
   0xa   :  { %16 = vsyncpa [#allocation5 + $0x1], 0  ;;  %s1570_s12 = smov 0   ;;  %s1572_s13 = smov 0  }
   0xb   :  { %s1574_s14 = smov 0   ;;  %s1576_s15 = smov 0  }
   0xc   :  { %s1578_s16 = smov 0   ;;  %s1580_s17 = smov 0  }
   0xd   :  { %s1582_s18 = smov 0   ;;  %s1584_s19 = smov 0  }
   0xe   :  { %s1586_s20 = smov 0   ;;  %s1588_s21 = smov 0  }
   0xf   :  { %s1590_s22 = smov 0   ;;  %s1592_s23 = smov 0  }
  0x10   :  { %s1594_s24 = smov 0   ;;  %s1596_s25 = smov 0  }
  0x11 LB: > { %1970 = sst [smem:[#allocation14_spill]] %s1483_s12  ;;  %s34_s26 = sadd.s32 1, %s1527_s23  ;;  %s1535_s25 = sphi %s1596_s25, %s22_s25   ;;  %s1531_s24 = sphi %s1594_s24, %s2014_s24   ;;  %s1527_s23 = sphi %s1592_s23, %s2013_s23   ;;  %s1523_s22 = sphi %s1590_s22, %s2012_s22   ;;  %s1519_s21 = sphi %s1588_s21, %s2011_s21   ;;  %s1515_s20 = sphi %s1586_s20, %s2010_s20   ;;  %s1511_s19 = sphi %s1584_s19, %s2009_s19   ;;  %s1507_s18 = sphi %s1582_s18, %s2008_s18   ;;  %s1503_s17 = sphi %s1580_s17, %s2007_s17   ;;  %s1499_s16 = sphi %s1578_s16, %s2006_s16   ;;  %s1495_s15 = sphi %s1576_s15, %s2005_s15   ;;  %s1491_s14 = sphi %s1574_s14, %s2004_s14   ;;  %s1487_s13 = sphi %s1572_s13, %s2003_s13   ;;  %s1483_s12 = sphi %s1570_s12, %s2000_s12  }
  0x12   : > { %1971 = sst [smem:[#allocation15_spill]] %s1487_s13  ;;  %s37_s27 = sadd.s32 1, %s1531_s24 }
  0x13   : > { %1972 = sst [smem:[#allocation16_spill]] %s1519_s21  ;;  %p35_p0 = scmp.ge.s32.totalorder %s34_s26, 2 }
  0x14   : > { %1973 = sst [smem:[#allocation17_spill]] %s1523_s22  ;;  %p58_p1 = scmp.eq.s32.totalorder %s1535_s25, 0 }
  0x15   : > { %s78_s28 = sadd.s32 1, %s1503_s17  ;;  %p85_p2 = scmp.ne.s32.totalorder %s1503_s17, %s1499_s16 }
  0x16   : > { %s2016_s26 = smov (%p35_p0, %s34_s26), 0  ;;  %s2018_s27 = smov (!%p35_p0, %s37_s27), %s1531_s24 }
  0x17   : > { %1974 = sst [smem:[#allocation18_spill]] %s2016_s26  ;;  %s1651_s29 = ssub.s32 %s1527_s23, %s2016_s26 }
  0x18   : > { %p1655_p3 = por %p85_p2, %p58_p1  ;;  %p39_p4 = scmp.ge.s32.totalorder %s2018_s27, 2 }
  0x19   : > { %p48_p5 = scmp.eq.s32.totalorder %s1651_s29, 0  ;;  %p91_p6 = scmp.ne.s32.totalorder %s1499_s16, %s1495_s15 }
  0x1a   : > { %s2020_s27 = smov (%p39_p4, %s2018_s27), 0  ;;  %p1965_p7 = scmp.lt.s32.totalorder %s1535_s25, 4 }
  0x1b   : > { %1976 = sst [smem:[#allocation19_spill]] %s2020_s27  ;;  %s1026_s4 = sshll.u32 %s1527_s23, 6 }
  0x1c   : > { %s1668_s5 = ssub.s32 %s1531_s24, %s2020_s27  ;;  %s192_s7 = sand.u32 1, %s1535_s25  }
  0x1d   : > { %s75_s6 = sor.u32 %s1668_s5, %s1651_s29  ;;  %s194_s8 = sand.u32 1, %s1503_s17  }
  0x1e   : > { %p76_p8 = scmp.eq.s32.totalorder %s75_s6, 0  ;;  %s1029_s9 = sshll.u32 %s1531_s24, 1 }
  0x1f   : > { %s1027_s11 = sshll.u32 %s194_s8, 7  ;;  %s203_s26 = sadd.s32 %s1029_s9, %s1026_s4 }
  0x20   : > { %s1676_s10 = scalar_select %p76_p8, %s1503_s17, %s78_s28  }
  0x21   : > { %s1031_s3 = sshll.u32 %s203_s26, 6  ;;  %s1977_s1 = sld [smem:[#allocation21_spill]] }
  0x22   : > { %s196_s12 = scalar_lea.vmem [#allocation6], %s1027_s11  ;;  %p1687_p9 = pnand %p1965_p7, %p1655_p3 }
  0x23   : > { %s206_s13 = sshll.u32 %s196_s12, 4  ;;  %p1035_p10 = scmp.ge.s32.totalorder %s1535_s25, 1  ;;  %s207_s13 = int_to_ptr.vmem [resolvable:$true] %s206_s13 }
  0x24   : > { %s1692_s28 = scalar_lea.sflag [#allocation7], %s192_s7  ;;  %p1301_p11 = pneg %p1687_p9 }
  0x25   : > { %s1312_s26 = scalar_lea.vmem %s207_s13, 2048 }
  0x26   : > { %p1313_p12 = scmp.ne.s32.totalorder %s207_s13, %s1312_s26 }
  0x27   : > { %s205_s2 = scalar_lea.hbm %s1977_s1, %s1031_s3  ;;  %s1537_s3 = smov [#allocation6]  }
  0x28   : > { %p1315_p13 = pnand %p1313_p12, %p1301_p11  ;;  %s1317_s21 = sshll.u32 %s1537_s3, 4  ;;  %s1318_s21 = int_to_ptr.vmem [resolvable:$false] %s1317_s21 }
  0x29   : > { %s1319_s12 = scalar_lea.vmem %s1318_s21, 4096  ;;  %p1320_p2 = scmp.lt.s32.totalorder %s207_s13, %s1318_s21 }
  0x2a   : > { %p1316_p0 = pneg %p1315_p13  ;;  %p1321_p4 = scmp.lt.s32.totalorder %s1319_s12, %s1312_s26 }
  0x2c   : > { %p1322_p3 = por %p1321_p4, %p1320_p2 }
  0x2e   : > { %p1323_p8 = pnand %p1322_p3, %p1316_p0 }
  0x30   : > { %1326 = shalt.err (!%p1323_p8)
}
  0x31   : > { %s1538_s22 = smov 256   ;;  %s1539_s30 = smov 128  }
  0x32   : > { %s1540_s6 = smov 8   ;;  %p233_p11 = scmp.lt.s32.totalorder %s1535_s25, 5 }
  0x33   : > { %1136 = dma.hbm_to_vmem [thread:$0]  (!%p1687_p9), %s205_s2, 2048, %s207_s13, %s1692_s28, %s1538_s22, %s1539_s30, %s1540_s6  }
  0x34   : > { %p1703_p12 = pnand %p1035_p10, %p233_p11  ;;  %s50_s8 = sadd.s32 1, %s1515_s20 }
  0x35   : > { %p57_p13 = scmp.ne.s32.totalorder %s1515_s20, %s1511_s19  ;;  %p63_p2 = scmp.ne.s32.totalorder %s1511_s19, %s1507_s18 }
  0x36   : > { %s1713_s9 = scalar_select %p48_p5, %s1515_s20, %s50_s8  }
  0x37   : > { %p59_p0 = por %p58_p1, %p57_p13  ;;  %s169_s11 = sand.u32 1, %s1515_s20  }
  0x38   : > { %s1980_s0 = sld [smem:[#allocation20_spill]]  ;;  %s1025_s13 = sshll.u32 %s169_s11, 6 }
  0x39   : > { %p1727_p9 = pnand %p1965_p7, %p59_p0  ;;  %s173_s21 = scalar_lea.vmem [#allocation3], %s1025_s13 }
  0x3a   : > { %s182_s29 = sshll.u32 %s173_s21, 4  ;;  %s170_s12 = scalar_lea.sflag [#allocation4], %s169_s11  ;;  %s183_s29 = int_to_ptr.vmem [resolvable:$true] %s182_s29 }
  0x3b   : > { %p1329_p5 = pneg %p1727_p9  ;;  %s1340_s22 = scalar_lea.vmem %s183_s29, 1024 }
  0x3c   : > { %p1341_p10 = scmp.ne.s32.totalorder %s183_s29, %s1340_s22  ;;  %s1541_s6 = smov [#allocation3]  }
  0x3d   : > { %s1345_s8 = sshll.u32 %s1541_s6, 4  ;;  %s1346_s8 = int_to_ptr.vmem [resolvable:$false] %s1345_s8 }
  0x3e   : > { %s181_s2 = scalar_lea.hbm %s1980_s0, %s1026_s4  ;;  %p1343_p4 = pnand %p1341_p10, %p1329_p5 }
  0x3f   : > { %s1347_s4 = scalar_lea.vmem %s1346_s8, 2048  ;;  %p1348_p8 = scmp.lt.s32.totalorder %s183_s29, %s1346_s8 }
  0x40   : > { %p1344_p3 = pneg %p1343_p4  ;;  %p1349_p11 = scmp.lt.s32.totalorder %s1347_s4, %s1340_s22 }
  0x42   : > { %p1350_p13 = por %p1349_p11, %p1348_p8 }
  0x44   : > { %p1351_p0 = pnand %p1350_p13, %p1344_p3 }
  0x46   : > { %1354 = shalt.err (!%p1351_p0)
}
  0x47   : > { %s1542_s26 = smov 64   ;;  %s1982_s11 = sld [smem:[#allocation15_spill]] }
  0x48   : > { %s1983_s27 = sld [smem:[#allocation14_spill]]  ;;  %s1543_s13 = smov 4  }
  0x49   : > { %1133 = dma.hbm_to_vmem [thread:$0]  (!%p1727_p9), %s181_s2, 1024, %s183_s29, %s170_s12, %s1539_s30, %s1542_s26, %s1543_s13  }
  0x4a   : > { %s1737_s21 = sadd.s32 4294967295, %s1535_s25   ;;  %s1022_s22 = sadd.s32 4294967294, %s1535_s25  }
  0x4b   : > { %p64_p5 = scmp.eq.s32.totalorder %s1737_s21, 0  ;;  %p102_p10 = scmp.eq.s32.totalorder %s1668_s5, 0 }
  0x4c   : > { %s104_s6 = sadd.s32 1, %s1491_s14  ;;  %p143_p11 = scmp.eq.s32.totalorder %s1737_s21, 3 }
  0x4d   : > { %p1746_p4 = por %p64_p5, %p63_p2  ;;  %p1753_p3 = por %p91_p6, %p64_p5 }
  0x4e   : > { %s1758_s30 = scalar_select %p102_p10, %s1491_s14, %s104_s6  }
  0x4f   : > { %p111_p9 = scmp.ne.s32.totalorder %s1491_s14, %s1982_s11  ;;  %p117_p8 = scmp.ne.s32.totalorder %s1982_s11, %s1983_s27 }
  0x50   : > { %p149_p13 = scmp.eq.s32.totalorder %s1022_s22, 3  ;;  %s218_s2 = sand.u32 1, %s1491_s14  }
  0x51   : > { %p113_p0 = por %p111_p9, %p58_p1  ;;  %p1767_p7 = por %p117_p8, %p64_p5 }
  0x52   : > { %p1771_p2 = por %p143_p11, %p111_p9  ;;  %p1775_p6 = por %p149_p13, %p117_p8 }
  0x53   : > { %s1088_s29 = sshll.u32 %s1531_s24, 5  ;;  %s1032_s12 = sshll.u32 %s218_s2, 1 }
  0x54   : > { %s1988_s15 = scalar_select %p1775_p6, 1, 0 }
  0x55   : > { %s1989_s11 = sld [smem:[#allocation22_spill]]  ;;  %p1990_p1 = scmp.lt.s32.totalorder %s1535_s25, 4 }
  0x56   : > { %s220_s22 = scalar_lea.vmem [#allocation8], %s1032_s12  ;;  %s1544_s2 = smov [#allocation8]  }
  0x57   : > { %p1786_p5 = pnand %p1990_p1, %p113_p0  ;;  %s228_s6 = sshll.u32 %s220_s22, 4  ;;  %s229_s6 = int_to_ptr.vmem [resolvable:$true] %s228_s6 }
  0x58   : > { %s1368_s0 = scalar_lea.vmem %s229_s6, 32  ;;  %s1373_s1 = sshll.u32 %s1544_s2, 4  ;;  %s1374_s1 = int_to_ptr.vmem [resolvable:$false] %s1373_s1 }
  0x59   : > { %p1357_p10 = pneg %p1786_p5  ;;  %p1369_p9 = scmp.ne.s32.totalorder %s229_s6, %s1368_s0 }
  0x5a   : > { %s1375_s4 = scalar_lea.vmem %s1374_s1, 64  ;;  %p1376_p13 = scmp.lt.s32.totalorder %s229_s6, %s1374_s1 }
  0x5b   : > { %s226_s27 = scalar_lea.hbm %s1989_s11, %s1088_s29  ;;  %p1371_p8 = pnand %p1369_p9, %p1357_p10 }
  0x5c   : > { %p1377_p6 = scmp.lt.s32.totalorder %s1375_s4, %s1368_s0 }
  0x5d   : > { %p1372_p11 = pneg %p1371_p8 }
  0x5e   : > { %p1378_p0 = por %p1377_p6, %p1376_p13 }
  0x60   : > { %p1379_p1 = pnand %p1378_p0, %p1372_p11 }
  0x62   : > { %1382 = shalt.err (!%p1379_p1)
}
  0x63   : > { %1139 = dma.hbm_to_vmem [thread:$0]  (!%p1786_p5), %s226_s27, 32, %s229_s6, %s1692_s28  }
  0x64   : > { %237 = sbr.rel (%p1703_p12) target bundleno = 458 (0x1ca), region = 32  ;;  %s239_s29 = sand.u32 (!%p1703_p12), 1, %s1511_s19  }
  0x65   : > { %s1036_s12 = sshll.u32 (!%p1703_p12), %s239_s29, 6  ;;  %s240_s26 = scalar_lea.sflag (!%p1703_p12), [#allocation4], %s239_s29 }
  0x66   : > { %s1798_s11 = scalar_lea.vmem (!%p1703_p12), [#allocation3], %s1036_s12 }
  0x69   : > { %1466 = dma.done.wait (%p1746_p4), %s240_s26, 1024  }
  0x6a   : > { %1468 = vsyncadd (%p1746_p4), %s240_s26, 4294966272  ;;  %s248_s0 = sand.u32 1, %s1737_s21   ;;  %s250_s1 = sand.u32 1, %s1499_s16  }
  0x6b   : > { %s1037_s28 = sshll.u32 %s250_s1, 7  ;;  %s249_s7 = scalar_lea.sflag [#allocation7], %s248_s0 }
  0x6c   : > { %s1806_s27 = scalar_lea.vmem [#allocation6], %s1037_s28 }
  0x6d   : > { %1470 = dma.done.wait (%p1753_p3), %s249_s7, 2048  }
  0x6e   : > { %1472 = vsyncadd (%p1753_p3), %s249_s7, 4294965248  ;;  %s1992_s13 = sld [smem:[#allocation15_spill]] }
  0x74   : > { %s1813_s22 = sand.u32 1, %s1992_s13  }
  0x75   : > { %s1038_s8 = sshll.u32 %s1813_s22, 1 }
  0x76   : > { %s261_s6 = scalar_lea.vmem [#allocation8], %s1038_s8 }
  0x77   : > { %1474 = dma.done.wait (%p1767_p7), %s249_s7, 32  }
  0x78   : > { %1476 = vsyncadd (%p1767_p7), %s249_s7, 4294967264  ;;  %s1039_s21 = sshll.u32 %s1813_s22, 7  ;;  %s1993_s4 = sld [smem:[#allocation16_spill]] }
  0x79   : > { %s1821_s2 = scalar_lea.vmem [#allocation9], %s1039_s21 }
  0x7e   : > { %p1040_p12 = scmp.ne.s32.totalorder %s1993_s4, 0 }
  0x80   : > { %304 = sbr.rel (%p1040_p12) target bundleno = 157 (0x9d), region = 48 }
  0x85   : > { %v307_v0 = vlaneseq  ;;  %v305_v2 = vld [vmem:[%s261_s6] sm:$0x3] }
  0x87   : > { %v308_v1 = vshrl.u32 %v307_v0, 7 }
  0x89   : > { %v309_v3 = vsub.s32 0, %v308_v1  ;;  %v313_v4 = vsub.s32 1, %v308_v1 }
  0x8b   : > { %v310_v5 = vrot.slane %v305_v2, %v309_v3  ;;  %v314_v6 = vrot.slane %v305_v2, %v313_v4 }
  0x8d   : > { %317 = vst [vmem:[#allocation2 + $0xb0] sm:$0xff] %v310_v5  ;;  %319 = vst [vmem:[#allocation2 + $0xd8] sm:$0xff] %v310_v5 }
  0x8e   : > { %321 = vst [vmem:[#allocation2 + $0x50] sm:$0xff] %v310_v5  ;;  %323 = vst [vmem:[#allocation2 + $0x30] sm:$0xff] %v310_v5 }
  0x8f   : > { %325 = vst [vmem:[#allocation2 + $0x80] sm:$0xff] %v310_v5  ;;  %327 = vst [vmem:[#allocation2 + $0xe8] sm:$0xff] %v310_v5 }
  0x90   : > { %329 = vst [vmem:[#allocation2 + $0x60] sm:$0xff] %v310_v5  ;;  %331 = vst [vmem:[#allocation2 + $0x8] sm:$0xff] %v310_v5 }
  0x91   : > { %333 = vst [vmem:[#allocation2 + $0x38] sm:$0xff] %v310_v5  ;;  %335 = vst [vmem:[#allocation2 + $0x40] sm:$0xff] %v310_v5 }
  0x92   : > { %337 = vst [vmem:[#allocation2 + $0xe0] sm:$0xff] %v310_v5  ;;  %339 = vst [vmem:[#allocation2 + $0x70] sm:$0xff] %v310_v5 }
  0x93   : > { %341 = vst [vmem:[#allocation2 + $0xa8] sm:$0xff] %v310_v5  ;;  %343 = vst [vmem:[#allocation2 + $0x10] sm:$0xff] %v310_v5 }
  0x94   : > { %345 = vst [vmem:[#allocation2 + $0xa0] sm:$0xff] %v310_v5  ;;  %347 = vst [vmem:[#allocation2 + $0x20] sm:$0xff] %v310_v5 }
  0x95   : > { %318 = vst [vmem:[#allocation2] sm:$0xff] %v314_v6  ;;  %320 = vst [vmem:[#allocation2 + $0x18] sm:$0xff] %v314_v6 }
  0x96   : > { %322 = vst [vmem:[#allocation2 + $0x68] sm:$0xff] %v314_v6  ;;  %324 = vst [vmem:[#allocation2 + $0x48] sm:$0xff] %v314_v6 }
  0x97   : > { %326 = vst [vmem:[#allocation2 + $0x88] sm:$0xff] %v314_v6  ;;  %328 = vst [vmem:[#allocation2 + $0xb8] sm:$0xff] %v314_v6 }
  0x98   : > { %330 = vst [vmem:[#allocation2 + $0xf0] sm:$0xff] %v314_v6  ;;  %332 = vst [vmem:[#allocation2 + $0x78] sm:$0xff] %v314_v6 }
  0x99   : > { %334 = vst [vmem:[#allocation2 + $0x58] sm:$0xff] %v314_v6  ;;  %336 = vst [vmem:[#allocation2 + $0xc8] sm:$0xff] %v314_v6 }
  0x9a   : > { %338 = vst [vmem:[#allocation2 + $0x90] sm:$0xff] %v314_v6  ;;  %340 = vst [vmem:[#allocation2 + $0xc0] sm:$0xff] %v314_v6 }
  0x9b   : > { %342 = vst [vmem:[#allocation2 + $0xd0] sm:$0xff] %v314_v6  ;;  %344 = vst [vmem:[#allocation2 + $0x28] sm:$0xff] %v314_v6 }
  0x9c   : > { %346 = vst [vmem:[#allocation2 + $0xf8] sm:$0xff] %v314_v6  ;;  %348 = vst [vmem:[#allocation2 + $0x98] sm:$0xff] %v314_v6 }
  0x9d PF: > { %v1267_v7 = vld [vmem:[%s1806_s27 + $0x74] ss:$8 sps:$4 sm:$0xff]   ;;  %v1269_v8 = vld [vmem:[%s1806_s27 + $0x70] ss:$8 sps:$4 sm:$0xff]   ;;  %v1545_v9 = vmov 0   ;;  %v1291_v24 = vld [vmem:[%s1798_s11] sm:$0xff]  }
  0x9e   : > { %573 = vmatprep.mubr.bf16.mxu0 %v1545_v9  ;;  %613 = vmatprep.mubr.bf16.mxu1 %v1545_v9  ;;  %v1270_v10 = vld [vmem:[%s1806_s27 + $0x64] ss:$8 sps:$4 sm:$0xff]   ;;  %v1272_v11 = vld [vmem:[%s1806_s27 + $0x60] ss:$8 sps:$4 sm:$0xff]   ;;  %v1273_v12 = vld [vmem:[%s1806_s27 + $0x54] ss:$8 sps:$4 sm:$0xff]  }
  0x9f   : > { %541 = vmatprep.subr.bf16.mxu0 %v1267_v7  ;;  %1106 = vmatprep.subr.bf16.mxu1 %v1267_v7  ;;  %v1275_v13 = vld [vmem:[%s1806_s27 + $0x50] ss:$8 sps:$4 sm:$0xff]   ;;  %v1276_v14 = vld [vmem:[%s1806_s27 + $0x44] ss:$8 sps:$4 sm:$0xff]   ;;  %v1278_v15 = vld [vmem:[%s1806_s27 + $0x40] ss:$8 sps:$4 sm:$0xff]  }
  0xa0   : > { %542 = vmatpush1.bf16.msra.mxu0 %v1269_v8  ;;  %1114 = vmatpush1.bf16.msra.mxu1 %v1269_v8  ;;  %v1279_v16 = vld [vmem:[%s1806_s27 + $0x34] ss:$8 sps:$4 sm:$0xff]   ;;  %v1281_v17 = vld [vmem:[%s1806_s27 + $0x30] ss:$8 sps:$4 sm:$0xff]   ;;  %v1282_v18 = vld [vmem:[%s1806_s27 + $0x24] ss:$8 sps:$4 sm:$0xff]  }
  0xa1   : > { %543 = vmatprep.subr.bf16.mxu0 %v1270_v10  ;;  %1107 = vmatprep.subr.bf16.mxu1 %v1270_v10  ;;  %v1284_v19 = vld [vmem:[%s1806_s27 + $0x20] ss:$8 sps:$4 sm:$0xff]   ;;  %v1285_v20 = vld [vmem:[%s1806_s27 + $0x14] ss:$8 sps:$4 sm:$0xff]   ;;  %v1287_v21 = vld [vmem:[%s1806_s27 + $0x10] ss:$8 sps:$4 sm:$0xff]  }
  0xa2   : > { %v1288_v22 = vld [vmem:[%s1806_s27 + $0x4] ss:$8 sps:$4 sm:$0xff]   ;;  %v1290_v23 = vld [vmem:[%s1806_s27] ss:$8 sps:$4 sm:$0xff]   ;;  %v1295_v28 = vld [vmem:[%s1798_s11 + $0x10] sm:$0xff]   ;;  %s1994_s3 = sld [smem:[#allocation16_spill]] }
  0xa3   : > { %v1292_v25 = vld [vmem:[%s1798_s11 + $0x20] sm:$0xff]   ;;  %v1293_v26 = vld [vmem:[%s1798_s11 + $0x8] sm:$0xff]   ;;  %v1296_v29 = vld [vmem:[%s1798_s11 + $0x30] sm:$0xff]  }
  0xa4   : > { %544 = vmatpush1.bf16.msra.mxu0 %v1272_v11  ;;  %1115 = vmatpush1.bf16.msra.mxu1 %v1272_v11  ;;  %v1294_v27 = vld [vmem:[%s1798_s11 + $0x28] sm:$0xff]   ;;  %v1297_v30 = vld [vmem:[%s1798_s11 + $0x18] sm:$0xff]   ;;  %v349_v32 = vld [vmem:[#allocation2 + $0xb0] sm:$0xff] }
  0xa5   : > { %545 = vmatprep.subr.bf16.mxu0 %v1273_v12  ;;  %1108 = vmatprep.subr.bf16.mxu1 %v1273_v12  ;;  %v1298_v31 = vld [vmem:[%s1798_s11 + $0x38] sm:$0xff]   ;;  %v350_v36 = vld [vmem:[#allocation2] sm:$0xff]  ;;  %v368_v49 = vld [vmem:[#allocation2 + $0xc8] sm:$0xff] }
  0xa6   : > { %v365_v33 = vld [vmem:[#allocation2 + $0x38] sm:$0xff]  ;;  %v367_v43 = vld [vmem:[#allocation2 + $0x40] sm:$0xff]  ;;  %v353_v54 = vld [vmem:[#allocation2 + $0x50] sm:$0xff] }
  0xa7   : > { %v366_v37 = vld [vmem:[#allocation2 + $0x58] sm:$0xff]  ;;  %v369_v55 = vld [vmem:[#allocation2 + $0xe0] sm:$0xff]  ;;  %v354_v60 = vld [vmem:[#allocation2 + $0x68] sm:$0xff] }
  0xa8   : > { %546 = vmatpush1.bf16.msra.mxu0 %v1275_v13  ;;  %1116 = vmatpush1.bf16.msra.mxu1 %v1275_v13  ;;  %v351_v42 = vld [vmem:[#allocation2 + $0xd8] sm:$0xff]  ;;  %v370_v61 = vld [vmem:[#allocation2 + $0x90] sm:$0xff]  ;;  %v356_v8 = vld [vmem:[#allocation2 + $0x48] sm:$0xff]  ;;  %p1065_p7 = scmp.ne.s32.totalorder %s1994_s3, 1 }
  0xa9   : > { %547 = vmatprep.subr.bf16.mxu0 %v1276_v14  ;;  %1109 = vmatprep.subr.bf16.mxu1 %v1276_v14  ;;  %v352_v48 = vld [vmem:[#allocation2 + $0x18] sm:$0xff]  ;;  %v355_v2 = vld [vmem:[#allocation2 + $0x30] sm:$0xff]  ;;  %v357_v14 = vld [vmem:[#allocation2 + $0x80] sm:$0xff] }
  0xaa   : > { %v371_v3 = vld [vmem:[#allocation2 + $0x70] sm:$0xff] }
  0xac   : > { %548 = vmatpush1.bf16.msra.mxu0 %v1278_v15  ;;  %1117 = vmatpush1.bf16.msra.mxu1 %v1278_v15  ;;  %v373_v15 = vld [vmem:[#allocation2 + $0xa8] sm:$0xff] }
  0xad   : > { %549 = vmatprep.subr.bf16.mxu0 %v1279_v16  ;;  %1110 = vmatprep.subr.bf16.mxu1 %v1279_v16 }
  0xb0   : > { %550 = vmatpush1.bf16.msra.mxu0 %v1281_v17  ;;  %1118 = vmatpush1.bf16.msra.mxu1 %v1281_v17 }
  0xb1   : > { %551 = vmatprep.subr.bf16.mxu0 %v1282_v18  ;;  %1111 = vmatprep.subr.bf16.mxu1 %v1282_v18 }
  0xb4   : > { %552 = vmatpush1.bf16.msra.mxu0 %v1284_v19  ;;  %1119 = vmatpush1.bf16.msra.mxu1 %v1284_v19 }
  0xb5   : > { %553 = vmatprep.subr.bf16.mxu0 %v1285_v20  ;;  %1112 = vmatprep.subr.bf16.mxu1 %v1285_v20  ;;  %v358_v20 = vld [vmem:[#allocation2 + $0x88] sm:$0xff] }
  0xb8   : > { %554 = vmatpush1.bf16.msra.mxu0 %v1287_v21  ;;  %1120 = vmatpush1.bf16.msra.mxu1 %v1287_v21  ;;  %v374_v21 = vld [vmem:[#allocation2 + $0xd0] sm:$0xff] }
  0xb9   : > { %555 = vmatprep.subr.bf16.mxu0 %v1288_v22  ;;  %1113 = vmatprep.subr.bf16.mxu1 %v1288_v22 }
  0xbc   : > { %556 = vmatpush1.bf16.msra.mxu0 %v1290_v23  ;;  %1121 = vmatpush1.bf16.msra.mxu1 %v1290_v23 }
  0xbf   : > { %574 = vmatmul.mubr.bf16.vlgmr.msra.gmra.mxu0 %v1291_v24  ;;  %614 = vmatmul.mubr.bf16.vlgmr.msra.gmra.mxu1 %v1292_v25 }
  0xc0   : > { %583 = vmatprep.mubr.bf16.mxu0 %v1545_v9  ;;  %623 = vmatprep.mubr.bf16.mxu1 %v1545_v9 }
  0xc7   : > { %584 = vmatmul.mubr.bf16.gmra.mxu0 %v1293_v26  ;;  %624 = vmatmul.mubr.bf16.gmra.mxu1 %v1294_v27  ;;  %v359_v26 = vld [vmem:[#allocation2 + $0xe8] sm:$0xff]  ;;  %v375_v27 = vld [vmem:[#allocation2 + $0x10] sm:$0xff] }
  0xc8   : > { %593 = vmatprep.mubr.bf16.mxu0 %v1545_v9  ;;  %633 = vmatprep.mubr.bf16.mxu1 %v1545_v9 }
  0xcf   : > { %594 = vmatmul.mubr.bf16.gmra.mxu0 %v1295_v28  ;;  %634 = vmatmul.mubr.bf16.gmra.mxu1 %v1296_v29 }
  0xd0   : > { %603 = vmatprep.mubr.bf16.mxu0 %v1545_v9  ;;  %643 = vmatprep.mubr.bf16.mxu1 %v1545_v9  ;;  %v372_v9 = vld [vmem:[#allocation2 + $0xc0] sm:$0xff] }
  0xd7   : > { %604 = vmatmul.mubr.bf16.gmra.mxu0 %v1297_v30  ;;  %644 = vmatmul.mubr.bf16.gmra.mxu1 %v1298_v31 }
 0x17f   : > { %v575_v34 = vpop.f32.mrf.mxu0  ;;  %v615_v35 = vpop.f32.mrf.mxu1 }
 0x180   : > { %v654_v38 = vadd.f32 %v575_v34, %v349_v32  ;;  %v670_v39 = vadd.f32 %v615_v35, %v365_v33  ;;  %v360_v32 = vld [vmem:[#allocation2 + $0xb8] sm:$0xff]  ;;  %v376_v33 = vld [vmem:[#allocation2 + $0x28] sm:$0xff] }
 0x181   : > { %v577_v40 = vpop.f32.mrf.mxu0  ;;  %v617_v41 = vpop.f32.mrf.mxu1 }
 0x182   : > { %686 = vst [vmem:[#allocation2 + $0xb0] sm:$0xff] %v654_v38  ;;  %702 = vst [vmem:[#allocation2 + $0x38] sm:$0xff] %v670_v39  ;;  %v655_v44 = vadd.f32 %v577_v40, %v350_v36  ;;  %v671_v45 = vadd.f32 %v617_v41, %v366_v37  ;;  %v361_v38 = vld [vmem:[#allocation2 + $0x60] sm:$0xff] }
 0x183   : > { %v579_v46 = vpop.f32.mrf.mxu0  ;;  %v619_v47 = vpop.f32.mrf.mxu1  ;;  %v377_v39 = vld [vmem:[#allocation2 + $0xa0] sm:$0xff] }
 0x184   : > { %687 = vst [vmem:[#allocation2] sm:$0xff] %v655_v44  ;;  %703 = vst [vmem:[#allocation2 + $0x58] sm:$0xff] %v671_v45  ;;  %v656_v50 = vadd.f32 %v579_v46, %v351_v42  ;;  %v672_v51 = vadd.f32 %v619_v47, %v367_v43  ;;  %v362_v44 = vld [vmem:[#allocation2 + $0xf0] sm:$0xff]  ;;  %v378_v45 = vld [vmem:[#allocation2 + $0xf8] sm:$0xff] }
 0x185   : > { %v581_v52 = vpop.f32.mrf.mxu0  ;;  %v621_v53 = vpop.f32.mrf.mxu1 }
 0x186   : > { %688 = vst [vmem:[#allocation2 + $0xd8] sm:$0xff] %v656_v50  ;;  %704 = vst [vmem:[#allocation2 + $0x40] sm:$0xff] %v672_v51  ;;  %v657_v56 = vadd.f32 %v581_v52, %v352_v48  ;;  %v673_v57 = vadd.f32 %v621_v53, %v368_v49  ;;  %v363_v50 = vld [vmem:[#allocation2 + $0x8] sm:$0xff]  ;;  %v379_v51 = vld [vmem:[#allocation2 + $0x20] sm:$0xff] }
 0x187   : > { %v585_v58 = vpop.f32.mrf.mxu0  ;;  %v625_v59 = vpop.f32.mrf.mxu1 }
 0x188   : > { %689 = vst [vmem:[#allocation2 + $0x18] sm:$0xff] %v657_v56  ;;  %705 = vst [vmem:[#allocation2 + $0xc8] sm:$0xff] %v673_v57  ;;  %v658_v62 = vadd.f32 %v585_v58, %v353_v54  ;;  %v674_v63 = vadd.f32 %v625_v59, %v369_v55  ;;  %v364_v56 = vld [vmem:[#allocation2 + $0x78] sm:$0xff] }
 0x189   : > { %v587_v0 = vpop.f32.mrf.mxu0  ;;  %v627_v1 = vpop.f32.mrf.mxu1  ;;  %v380_v57 = vld [vmem:[#allocation2 + $0x98] sm:$0xff] }
 0x18a   : > { %690 = vst [vmem:[#allocation2 + $0x50] sm:$0xff] %v658_v62  ;;  %706 = vst [vmem:[#allocation2 + $0xe0] sm:$0xff] %v674_v63  ;;  %v659_v4 = vadd.f32 %v587_v0, %v354_v60  ;;  %v675_v5 = vadd.f32 %v627_v1, %v370_v61 }
 0x18b   : > { %v589_v6 = vpop.f32.mrf.mxu0  ;;  %v629_v7 = vpop.f32.mrf.mxu1 }
 0x18c   : > { %691 = vst [vmem:[#allocation2 + $0x68] sm:$0xff] %v659_v4  ;;  %707 = vst [vmem:[#allocation2 + $0x90] sm:$0xff] %v675_v5  ;;  %v660_v10 = vadd.f32 %v589_v6, %v355_v2  ;;  %v676_v11 = vadd.f32 %v629_v7, %v371_v3 }
 0x18d   : > { %v591_v12 = vpop.f32.mrf.mxu0  ;;  %v631_v13 = vpop.f32.mrf.mxu1 }
 0x18e   : > { %692 = vst [vmem:[#allocation2 + $0x30] sm:$0xff] %v660_v10  ;;  %708 = vst [vmem:[#allocation2 + $0x70] sm:$0xff] %v676_v11  ;;  %v661_v16 = vadd.f32 %v591_v12, %v356_v8  ;;  %v677_v17 = vadd.f32 %v631_v13, %v372_v9 }
 0x18f   : > { %v595_v18 = vpop.f32.mrf.mxu0  ;;  %v635_v19 = vpop.f32.mrf.mxu1 }
 0x190   : > { %693 = vst [vmem:[#allocation2 + $0x48] sm:$0xff] %v661_v16  ;;  %709 = vst [vmem:[#allocation2 + $0xc0] sm:$0xff] %v677_v17  ;;  %v662_v22 = vadd.f32 %v595_v18, %v357_v14  ;;  %v678_v23 = vadd.f32 %v635_v19, %v373_v15 }
 0x191   : > { %v597_v24 = vpop.f32.mrf.mxu0  ;;  %v637_v25 = vpop.f32.mrf.mxu1 }
 0x192   : > { %694 = vst [vmem:[#allocation2 + $0x80] sm:$0xff] %v662_v22  ;;  %710 = vst [vmem:[#allocation2 + $0xa8] sm:$0xff] %v678_v23  ;;  %v663_v28 = vadd.f32 %v597_v24, %v358_v20  ;;  %v679_v29 = vadd.f32 %v637_v25, %v374_v21 }
 0x193   : > { %v599_v30 = vpop.f32.mrf.mxu0  ;;  %v639_v31 = vpop.f32.mrf.mxu1 }
 0x194   : > { %695 = vst [vmem:[#allocation2 + $0x88] sm:$0xff] %v663_v28  ;;  %711 = vst [vmem:[#allocation2 + $0xd0] sm:$0xff] %v679_v29  ;;  %v664_v34 = vadd.f32 %v599_v30, %v359_v26  ;;  %v680_v35 = vadd.f32 %v639_v31, %v375_v27 }
 0x195   : > { %v601_v36 = vpop.f32.mrf.mxu0  ;;  %v641_v37 = vpop.f32.mrf.mxu1 }
 0x196   : > { %696 = vst [vmem:[#allocation2 + $0xe8] sm:$0xff] %v664_v34  ;;  %712 = vst [vmem:[#allocation2 + $0x10] sm:$0xff] %v680_v35  ;;  %v665_v40 = vadd.f32 %v601_v36, %v360_v32  ;;  %v681_v41 = vadd.f32 %v641_v37, %v376_v33 }
 0x197   : > { %v605_v42 = vpop.f32.mrf.mxu0  ;;  %v645_v43 = vpop.f32.mrf.mxu1 }
 0x198   : > { %697 = vst [vmem:[#allocation2 + $0xb8] sm:$0xff] %v665_v40  ;;  %713 = vst [vmem:[#allocation2 + $0x28] sm:$0xff] %v681_v41  ;;  %v666_v46 = vadd.f32 %v605_v42, %v361_v38  ;;  %v682_v47 = vadd.f32 %v645_v43, %v377_v39 }
 0x199   : > { %v607_v48 = vpop.f32.mrf.mxu0  ;;  %v647_v49 = vpop.f32.mrf.mxu1 }
 0x19a   : > { %698 = vst [vmem:[#allocation2 + $0x60] sm:$0xff] %v666_v46  ;;  %714 = vst [vmem:[#allocation2 + $0xa0] sm:$0xff] %v682_v47  ;;  %v667_v52 = vadd.f32 %v607_v48, %v362_v44  ;;  %v683_v53 = vadd.f32 %v647_v49, %v378_v45 }
 0x19b   : > { %v609_v54 = vpop.f32.mrf.mxu0  ;;  %v649_v55 = vpop.f32.mrf.mxu1 }
 0x19c   : > { %699 = vst [vmem:[#allocation2 + $0xf0] sm:$0xff] %v667_v52  ;;  %715 = vst [vmem:[#allocation2 + $0xf8] sm:$0xff] %v683_v53  ;;  %v668_v58 = vadd.f32 %v609_v54, %v363_v50  ;;  %v684_v59 = vadd.f32 %v649_v55, %v379_v51  ;;  %721 = sbr.rel (%p1065_p7) target bundleno = 432 (0x1b0), region = 52 }
 0x19d   : > { %v611_v60 = vpop.f32.mrf.mxu0  ;;  %v651_v61 = vpop.f32.mrf.mxu1 }
 0x19e   : > { %700 = vst [vmem:[#allocation2 + $0x8] sm:$0xff] %v668_v58  ;;  %716 = vst [vmem:[#allocation2 + $0x20] sm:$0xff] %v684_v59  ;;  %v669_v62 = vadd.f32 %v611_v60, %v364_v56  ;;  %v685_v63 = vadd.f32 %v651_v61, %v380_v57 }
 0x1a0   : > { %701 = vst [vmem:[#allocation2 + $0x78] sm:$0xff] %v669_v62  ;;  %717 = vst [vmem:[#allocation2 + $0x98] sm:$0xff] %v685_v63 }
 0x1a1   : > { %v722_v0 = vld [vmem:[#allocation2 + $0xb0] sm:$0xff]  ;;  %v723_v1 = vld [vmem:[#allocation2] sm:$0xff]  ;;  %v724_v2 = vld [vmem:[#allocation2 + $0xd8] sm:$0xff] }
 0x1a2   : > { %v1089_v3 = vpack.c.bf16 %v723_v1, %v722_v0  ;;  %v725_v4 = vld [vmem:[#allocation2 + $0x18] sm:$0xff]  ;;  %v726_v5 = vld [vmem:[#allocation2 + $0x50] sm:$0xff]  ;;  %v727_v6 = vld [vmem:[#allocation2 + $0x68] sm:$0xff] }
 0x1a3   : > { %v1090_v7 = vpack.c.bf16 %v725_v4, %v724_v2  ;;  %v1091_v8 = vpack.c.bf16 %v727_v6, %v726_v5  ;;  %v728_v9 = vld [vmem:[#allocation2 + $0x30] sm:$0xff]  ;;  %v729_v10 = vld [vmem:[#allocation2 + $0x48] sm:$0xff]  ;;  %v730_v11 = vld [vmem:[#allocation2 + $0x80] sm:$0xff] }
 0x1a4   : > { %850 = vst [vmem:[%s1821_s2] sm:$0xff] %v1089_v3  ;;  %v1092_v12 = vpack.c.bf16 %v729_v10, %v728_v9  ;;  %v731_v13 = vld [vmem:[#allocation2 + $0x88] sm:$0xff]  ;;  %v733_v15 = vld [vmem:[#allocation2 + $0xb8] sm:$0xff]  ;;  %v734_v18 = vld [vmem:[#allocation2 + $0x60] sm:$0xff] }
 0x1a5   : > { %v732_v14 = vld [vmem:[#allocation2 + $0xe8] sm:$0xff]  ;;  %851 = vst [vmem:[%s1821_s2 + $0x8] sm:$0xff] %v1090_v7  ;;  %852 = vst [vmem:[%s1821_s2 + $0x10] sm:$0xff] %v1091_v8  ;;  %v1093_v16 = vpack.c.bf16 %v731_v13, %v730_v11  ;;  %v735_v19 = vld [vmem:[#allocation2 + $0xf0] sm:$0xff] }
 0x1a6   : > { %v1094_v17 = vpack.c.bf16 %v733_v15, %v732_v14  ;;  %v736_v20 = vld [vmem:[#allocation2 + $0x8] sm:$0xff]  ;;  %853 = vst [vmem:[%s1821_s2 + $0x18] sm:$0xff] %v1092_v12  ;;  %v1095_v21 = vpack.c.bf16 %v735_v19, %v734_v18  ;;  %v738_v23 = vld [vmem:[#allocation2 + $0x38] sm:$0xff]  ;;  %v740_v27 = vld [vmem:[#allocation2 + $0x40] sm:$0xff] }
 0x1a7   : > { %v737_v22 = vld [vmem:[#allocation2 + $0x78] sm:$0xff]  ;;  %854 = vst [vmem:[%s1821_s2 + $0x20] sm:$0xff] %v1093_v16  ;;  %v741_v28 = vld [vmem:[#allocation2 + $0xc8] sm:$0xff]  ;;  %v742_v29 = vld [vmem:[#allocation2 + $0xe0] sm:$0xff] }
 0x1a8   : > { %v739_v24 = vld [vmem:[#allocation2 + $0x58] sm:$0xff]  ;;  %855 = vst [vmem:[%s1821_s2 + $0x28] sm:$0xff] %v1094_v17  ;;  %v1096_v25 = vpack.c.bf16 %v737_v22, %v736_v20  ;;  %856 = vst [vmem:[%s1821_s2 + $0x30] sm:$0xff] %v1095_v21  ;;  %v1098_v30 = vpack.c.bf16 %v741_v28, %v740_v27  ;;  %v743_v31 = vld [vmem:[#allocation2 + $0x90] sm:$0xff] }
 0x1a9   : > { %v1097_v26 = vpack.c.bf16 %v739_v24, %v738_v23  ;;  %v744_v32 = vld [vmem:[#allocation2 + $0x70] sm:$0xff]  ;;  %v745_v33 = vld [vmem:[#allocation2 + $0xc0] sm:$0xff]  ;;  %v1099_v34 = vpack.c.bf16 %v743_v31, %v742_v29  ;;  %v746_v36 = vld [vmem:[#allocation2 + $0xa8] sm:$0xff] }
 0x1aa   : > { %857 = vst [vmem:[%s1821_s2 + $0x38] sm:$0xff] %v1096_v25  ;;  %v1100_v35 = vpack.c.bf16 %v745_v33, %v744_v32  ;;  %v747_v37 = vld [vmem:[#allocation2 + $0xd0] sm:$0xff]  ;;  %859 = vst [vmem:[%s1821_s2 + $0x48] sm:$0xff] %v1098_v30  ;;  %v749_v40 = vld [vmem:[#allocation2 + $0x28] sm:$0xff] }
 0x1ab   : > { %858 = vst [vmem:[%s1821_s2 + $0x40] sm:$0xff] %v1097_v26  ;;  %v748_v38 = vld [vmem:[#allocation2 + $0x10] sm:$0xff]  ;;  %v1101_v39 = vpack.c.bf16 %v747_v37, %v746_v36  ;;  %v750_v41 = vld [vmem:[#allocation2 + $0xa0] sm:$0xff]  ;;  %v751_v42 = vld [vmem:[#allocation2 + $0xf8] sm:$0xff] }
 0x1ac   : > { %860 = vst [vmem:[%s1821_s2 + $0x50] sm:$0xff] %v1099_v34  ;;  %861 = vst [vmem:[%s1821_s2 + $0x58] sm:$0xff] %v1100_v35  ;;  %v1102_v43 = vpack.c.bf16 %v749_v40, %v748_v38  ;;  %v1103_v44 = vpack.c.bf16 %v751_v42, %v750_v41  ;;  %v752_v45 = vld [vmem:[#allocation2 + $0x20] sm:$0xff]  ;;  %v753_v46 = vld [vmem:[#allocation2 + $0x98] sm:$0xff] }
 0x1ad   : > { %862 = vst [vmem:[%s1821_s2 + $0x60] sm:$0xff] %v1101_v39  ;;  %v1104_v47 = vpack.c.bf16 %v753_v46, %v752_v45 }
 0x1ae   : > { %863 = vst [vmem:[%s1821_s2 + $0x68] sm:$0xff] %v1102_v43  ;;  %864 = vst [vmem:[%s1821_s2 + $0x70] sm:$0xff] %v1103_v44 }
 0x1af   : > { %865 = vst [vmem:[%s1821_s2 + $0x78] sm:$0xff] %v1104_v47 }
 0x1b0 PF: > { %s1995_s18 = sld [smem:[#allocation17_spill]]  ;;  %s883_s1 = sshll.u32 %s1821_s2, 4  ;;  %s1880_s1 = int_to_ptr.vmem [resolvable:$true] %s883_s1 }
 0x1b1   : > { %s1996_s11 = sld [smem:[#allocation23_spill]]  ;;  %s867_s28 = scalar_lea.sflag [#allocation5], %s1813_s22 }
 0x1b2   : > { %s1383_s7 = scalar_lea.vmem %s1880_s1, 2048  ;;  %s1546_s27 = smov [#allocation9]  }
 0x1b3   : > { %p1384_p4 = scmp.ne.s32.totalorder %s1880_s1, %s1383_s7  ;;  %s1387_s13 = sshll.u32 %s1546_s27, 4  ;;  %s1388_s13 = int_to_ptr.vmem [resolvable:$false] %s1387_s13 }
 0x1b4   : > { %s1389_s8 = scalar_lea.vmem %s1388_s13, 4096  ;;  %p1390_p5 = scmp.lt.s32.totalorder %s1880_s1, %s1388_s13 }
 0x1b5   : > { %p1385_p3 = pnand %p1384_p4, %p1771_p2  ;;  %p1391_p10 = scmp.lt.s32.totalorder %s1389_s8, %s1383_s7 }
 0x1b6   : > { %s1105_s29 = sshll.u32 %s1995_s18, 7 }
 0x1b7   : > { %s1877_s0 = scalar_lea.hbm %s1996_s11, %s1105_s29  ;;  %p1386_p6 = pneg %p1385_p3 }
 0x1b8   : > { %p1392_p9 = por %p1391_p10, %p1390_p5 }
 0x1ba   : > { %p1393_p8 = pnand %p1392_p9, %p1386_p6 }
 0x1bc   : > { %1396 = shalt.err (!%p1393_p8)
}
 0x1bd   : > { %s1397_s6 = scalar_lea.hbm %s1877_s0, 2048  ;;  %s1401_s4 = scalar_lea.hbm %s1996_s11, 4096 }
 0x1be   : > { %p1398_p11 = scmp.ne.s32.totalorder %s1877_s0, %s1397_s6  ;;  %p1402_p1 = scmp.lt.s32.totalorder %s1877_s0, %s1996_s11 }
 0x1bf   : > { %p1403_p12 = scmp.lt.s32.totalorder %s1401_s4, %s1397_s6 }
 0x1c0   : > { %p1399_p13 = pnand %p1398_p11, %p1771_p2 }
 0x1c1   : > { %p1404_p7 = por %p1403_p12, %p1402_p1 }
 0x1c2   : > { %p1400_p0 = pneg %p1399_p13 }
 0x1c4   : > { %p1405_p4 = pnand %p1404_p7, %p1400_p0 }
 0x1c6   : > { %1408 = shalt.err (!%p1405_p4)
}
 0x1c7   : > { %s1547_s29 = smov 128   ;;  %s1548_s12 = smov 256  }
 0x1c8   : > { %s1549_s26 = smov 8  }
 0x1c9   : > { %1128 = dma.vmem_to_hbm [thread:$0]  (%p1771_p2), %s1880_s1, 2048, %s1877_s0, %s867_s28, %s1547_s29, %s1548_s12, %s1549_s26  }
 0x1ca PF: > { %s1997_s7 = sld [smem:[#allocation14_spill]]  ;;  %p1145_p3 = scmp.ge.s32.totalorder %s1535_s25, 2 }
 0x1cb   : > { %p1998_p6 = scmp.ne.s32.totalorder %s1988_s15, 0 }
 0x1cd   : > { %p1141_p5 = pnand %p1145_p3, %p1998_p6 }
 0x1cf   : > { %p1142_p10 = pneg %p1141_p5 }
 0x1d0   : > { %s898_s27 = sand.u32 1, %s1997_s7  }
 0x1d1   : > { %s899_s13 = scalar_lea.sflag [#allocation5], %s898_s27 }
 0x1d2   : > { %1478 = dma.done.wait (%p1142_p10), %s899_s13, 2048  }
 0x1d3   : > { %1480 = vsyncadd (%p1142_p10), %s899_s13, 4294965248  ;;  %s22_s25 = sadd.s32 1, %s1535_s25   ;;  %s2000_s12 = sld [smem:[#allocation15_spill]] }
 0x1d4   : > { %p1910_p9 = scmp.ge.s32.totalorder %s22_s25, 6   ;;  %s2001_s5 = sld [smem:[#allocation18_spill]] }
 0x1d5   : > { %s2002_s0 = sld [smem:[#allocation19_spill]]  ;;  %s2003_s13 = smov %s1491_s14 }
 0x1d6   : > { %s2004_s14 = smov %s1758_s30  ;;  %s2005_s15 = smov %s1499_s16 }
 0x1d7   : > { %s2006_s16 = smov %s1503_s17  ;;  %s2007_s17 = smov %s1676_s10 }
 0x1d8   : > { %s2008_s18 = smov %s1511_s19  ;;  %s2009_s19 = smov %s1515_s20 }
 0x1d9   : > { %s2010_s20 = smov %s1713_s9  ;;  %s2011_s21 = smov %s1527_s23 }
 0x1da   : > { %s2012_s22 = smov %s1531_s24  ;;  %s2013_s23 = smov %s2001_s5 }
 0x1db   : > { %s2014_s24 = smov %s2002_s0  ;;  %21 = sbr.rel (!%p1910_p9) target bundleno = 17 (0x11), region = 109 }
 0x1e0   :  { %904 = vsyncpa [#allocation4], 1 }
 0x1e1   :  { %906 = vsyncpa [#allocation4 + $0x1], 1 }
 0x1e2   :  { %907 = vsyncpa [#allocation7], 1 }
 0x1e3   :  { %909 = vsyncpa [#allocation7 + $0x1], 1 }
 0x1e4   :  { %910 = vsyncpa [#allocation5], 1 }
 0x1e5   :  { %912 = vsyncpa [#allocation5 + $0x1], 1 }

</bundles_post_ra>
